<compile_context>
chip_gen: v5e
topology: v5e:2x2
jax: 0.10.0
libtpu: 0.0.40
codegen_flags: <defaults>
</compile_context>

<pallas_src>
import math
from functools import partial

import jax
import jax.numpy as jnp
from jax.experimental import pallas as pl
from jax.experimental.pallas import tpu as pltpu


def _round_up(x, m):
    return (x + m - 1) // m * m


def _tile_and_pad(dim, pref):
    """Tile = full dim when it fits in `pref` (always a legal block size);
    otherwise `pref` (multiple of 8/128) with the array padded to a multiple."""
    if dim <= pref:
        return dim, dim
    return pref, _round_up(dim, pref)


def _heads_per_block(num_heads, dh):
    """Heads per attention grid step so the block lane width is either the full
    hidden dim or a multiple of 128 (legal + lane-dense)."""
    hidden = num_heads * dh
    if hidden % 128 != 0:
        return num_heads
    for cand in range(1, num_heads + 1):
        if num_heads % cand == 0 and (cand * dh) % 128 == 0:
            return cand
    return num_heads


# ----------------------------- fused QKV projection -----------------------------
def _qkv_linear_kernel(x_ref, wq_ref, wk_ref, wv_ref, bq_ref, bk_ref, bv_ref,
                       q_ref, k_ref, v_ref, accq_ref, acck_ref, accv_ref):
    # x: (tm, tk) bf16, w*: (tk, tn) bf16, b*: (1, tn) f32, outs: (tm, tn) bf16.
    @pl.when(pl.program_id(2) == 0)
    def _init():
        accq_ref[...] = jnp.zeros_like(accq_ref)
        acck_ref[...] = jnp.zeros_like(acck_ref)
        accv_ref[...] = jnp.zeros_like(accv_ref)

    x = x_ref[...]
    accq_ref[...] += jnp.dot(x, wq_ref[...], preferred_element_type=jnp.float32)
    acck_ref[...] += jnp.dot(x, wk_ref[...], preferred_element_type=jnp.float32)
    accv_ref[...] += jnp.dot(x, wv_ref[...], preferred_element_type=jnp.float32)

    @pl.when(pl.program_id(2) == pl.num_programs(2) - 1)
    def _finalize():
        q_ref[...] = (accq_ref[...] + bq_ref[...]).astype(q_ref.dtype)
        k_ref[...] = (acck_ref[...] + bk_ref[...]).astype(k_ref.dtype)
        v_ref[...] = (accv_ref[...] + bv_ref[...]).astype(v_ref.dtype)


def pallas_qkv_projection(x2d, wq, wk, wv, bq, bk, bv, *, tm=256, tn=256, tk=512,
                          out_dtype=jnp.bfloat16):
    """x2d: (M, K) bf16; w*: (K, N) bf16; b*: (N,) f32 -> three (M, N) arrays."""
    M, K = x2d.shape
    N = wq.shape[1]

    tm, Mp = _tile_and_pad(M, tm)
    tn, Np = _tile_and_pad(N, tn)
    tk, Kp = _tile_and_pad(K, tk)

    if (Mp, Kp) != (M, K):
        x2d = jnp.pad(x2d, ((0, Mp - M), (0, Kp - K)))

    def padw(w):
        return w if (Kp == K and Np == N) else jnp.pad(w, ((0, Kp - K), (0, Np - N)))

    def padb(b):
        return (b if Np == N else jnp.pad(b, ((0, Np - N),))).reshape(1, Np)

    wq, wk, wv = padw(wq), padw(wk), padw(wv)
    bq, bk, bv = padb(bq), padb(bk), padb(bv)

    grid = (Mp // tm, Np // tn, Kp // tk)
    x_spec = pl.BlockSpec((tm, tk), lambda i, j, k: (i, k))
    w_spec = pl.BlockSpec((tk, tn), lambda i, j, k: (k, j))
    b_spec = pl.BlockSpec((1, tn), lambda i, j, k: (0, j))
    o_spec = pl.BlockSpec((tm, tn), lambda i, j, k: (i, j))

    outs = pl.pallas_call(
        _qkv_linear_kernel,
        out_shape=tuple(jax.ShapeDtypeStruct((Mp, Np), out_dtype) for _ in range(3)),
        grid=grid,
        in_specs=[x_spec, w_spec, w_spec, w_spec, b_spec, b_spec, b_spec],
        out_specs=(o_spec, o_spec, o_spec),
        scratch_shapes=[pltpu.VMEM((tm, tn), jnp.float32)] * 3,
        compiler_params=pltpu.CompilerParams(
            dimension_semantics=("parallel", "parallel", "arbitrary")),
        cost_estimate=pl.CostEstimate(
            flops=2 * Mp * (3 * Np) * Kp,
            transcendentals=0,
            bytes_accessed=(Mp * Kp + 3 * Kp * Np + 3 * Mp * Np) * 2),
    )(x2d, wq, wk, wv, bq, bk, bv)

    if (Mp, Np) != (M, N):
        outs = tuple(o[:M, :N] for o in outs)
    return outs


# ----------------------------- generic tiled linear (dense projection) -----------------------------
def _linear_kernel(x_ref, w_ref, b_ref, o_ref, acc_ref):
    @pl.when(pl.program_id(2) == 0)
    def _init():
        acc_ref[...] = jnp.zeros_like(acc_ref)

    acc_ref[...] += jnp.dot(x_ref[...], w_ref[...], preferred_element_type=jnp.float32)

    @pl.when(pl.program_id(2) == pl.num_programs(2) - 1)
    def _finalize():
        o_ref[...] = (acc_ref[...] + b_ref[...]).astype(o_ref.dtype)


def pallas_linear(x2d, w, b, *, tm=256, tn=256, tk=512, out_dtype=None):
    """x2d: (M, K) bf16, w: (K, N) bf16, b: (N,) f32 -> (M, N)."""
    M, K = x2d.shape
    N = w.shape[1]
    out_dtype = out_dtype or x2d.dtype

    tm, Mp = _tile_and_pad(M, tm)
    tn, Np = _tile_and_pad(N, tn)
    tk, Kp = _tile_and_pad(K, tk)

    if (Mp, Kp) != (M, K):
        x2d = jnp.pad(x2d, ((0, Mp - M), (0, Kp - K)))
    if (Kp, Np) != (K, N):
        w = jnp.pad(w, ((0, Kp - K), (0, Np - N)))
    b = (b if Np == N else jnp.pad(b, ((0, Np - N),))).reshape(1, Np)

    grid = (Mp // tm, Np // tn, Kp // tk)
    out = pl.pallas_call(
        _linear_kernel,
        out_shape=jax.ShapeDtypeStruct((Mp, Np), out_dtype),
        grid=grid,
        in_specs=[
            pl.BlockSpec((tm, tk), lambda i, j, k: (i, k)),
            pl.BlockSpec((tk, tn), lambda i, j, k: (k, j)),
            pl.BlockSpec((1, tn), lambda i, j, k: (0, j)),
        ],
        out_specs=pl.BlockSpec((tm, tn), lambda i, j, k: (i, j)),
        scratch_shapes=[pltpu.VMEM((tm, tn), jnp.float32)],
        compiler_params=pltpu.CompilerParams(
            dimension_semantics=("parallel", "parallel", "arbitrary")),
        cost_estimate=pl.CostEstimate(
            flops=2 * Mp * Np * Kp,
            transcendentals=0,
            bytes_accessed=(Mp * Kp + Kp * Np) * 2 + Mp * Np * 4),
    )(x2d, w, b)

    if (Mp, Np) != (M, N):
        out = out[:M, :N]
    return out


# ----------------------------- flash attention (triangular grid, online softmax) -----------------------------
def _flash_attn_kernel(qi_ref, ki_ref, q_ref, k_ref, v_ref, o_ref,
                       m_ref, l_ref, acc_ref, *, hpb, dh, tile):
    # q/k/v/o refs: (1, tile, hpb*dh) bf16 blocks of the per-array (B, Sp, hidden) tensors.
    # m: (hpb, tile, 1) f32; l/acc: (tile, hpb*dh) f32 (lane-dense, single finalize store).
    t = pl.program_id(2)
    qi = qi_ref[t]   # SMEM scalar prefetch: q-tile index of this grid step
    ki = ki_ref[t]   # SMEM scalar prefetch: kv-tile index (always <= qi)

    @pl.when(ki == 0)
    def _init():
        m_ref[...] = jnp.full_like(m_ref, -jnp.inf)
        l_ref[...] = jnp.zeros_like(l_ref)
        acc_ref[...] = jnp.zeros_like(acc_ref)

    def _accumulate(apply_causal_mask):
        if apply_causal_mask:
            # Diagonal tile (qi == ki): mask depends only on in-tile offsets.
            tri = (jax.lax.broadcasted_iota(jnp.int32, (tile, tile), 0)
                   >= jax.lax.broadcasted_iota(jnp.int32, (tile, tile), 1))
        for h in range(hpb):
            cols = slice(h * dh, (h + 1) * dh)        # static slice -> free Ref view
            q = q_ref[0, :, cols]                      # (tile, dh) bf16, scale pre-folded
            k = k_ref[0, :, cols]
            v = v_ref[0, :, cols]
            # scores = q @ k^T without materializing k.T
            s = jax.lax.dot_general(q, k, (((1,), (1,)), ((), ())),
                                    preferred_element_type=jnp.float32)
            if apply_causal_mask:
                s = jnp.where(tri, s, jnp.float32(-10000.0))
            m_prev = m_ref[h]                                          # (tile, 1)
            m_new = jnp.maximum(m_prev, jnp.max(s, axis=-1, keepdims=True))
            alpha = jnp.exp(m_prev - m_new)
            p = jnp.exp(s - m_new)
            l_ref[:, cols] = alpha * l_ref[:, cols] + jnp.sum(p, axis=-1, keepdims=True)
            acc_ref[:, cols] = alpha * acc_ref[:, cols] + jnp.dot(
                p.astype(v.dtype), v, preferred_element_type=jnp.float32)
            m_ref[h] = m_new

    @pl.when(ki < qi)
    def _off_diagonal():
        _accumulate(apply_causal_mask=False)

    @pl.when(ki == qi)   # diagonal tile == last kv step for this q tile
    def _diagonal_and_finalize():
        _accumulate(apply_causal_mask=True)
        inv_l = pl.reciprocal(l_ref[...], approx=True)   # EUP slot, nearly free
        o_ref[0] = (acc_ref[...] * inv_l).astype(o_ref.dtype)


def pallas_flash_attention(q, k, v, num_heads, head_dim, *, tile_pref=256):
    """q/k/v: (B, S, hidden) bf16 (q already scaled). Returns ctx (B, S, hidden) bf16."""
    B, S, hidden = q.shape
    dh = head_dim
    hpb = _heads_per_block(num_heads, dh)
    n_hb = num_heads // hpb
    width = hpb * dh

    tile, Sp = _tile_and_pad(S, tile_pref)
    if Sp != S:
        pad = ((0, 0), (0, Sp - S), (0, 0))
        q, k, v = jnp.pad(q, pad), jnp.pad(k, pad), jnp.pad(v, pad)
    n_q = Sp // tile

    # Lower-triangular (qi, ki) tile pairs -> no DMA / no step for masked-out tiles.
    pairs = [(a, c) for a in range(n_q) for c in range(a + 1)]
    qi_tab = jnp.asarray([p[0] for p in pairs], dtype=jnp.int32)
    ki_tab = jnp.asarray([p[1] for p in pairs], dtype=jnp.int32)
    n_steps = len(pairs)

    q_spec = pl.BlockSpec((1, tile, width), lambda b, hb, t, qt, kt: (b, qt[t], hb))
    kv_spec = pl.BlockSpec((1, tile, width), lambda b, hb, t, qt, kt: (b, kt[t], hb))
    o_spec = pl.BlockSpec((1, tile, width), lambda b, hb, t, qt, kt: (b, qt[t], hb))

    kern = partial(_flash_attn_kernel, hpb=hpb, dh=dh, tile=tile)
    itemsize = q.dtype.itemsize

    ctx = pl.pallas_call(
        kern,
        out_shape=jax.ShapeDtypeStruct((B, Sp, hidden), q.dtype),
        grid_spec=pltpu.PrefetchScalarGridSpec(
            num_scalar_prefetch=2,
            grid=(B, n_hb, n_steps),
            in_specs=[q_spec, kv_spec, kv_spec],
            out_specs=o_spec,
            scratch_shapes=[
                pltpu.VMEM((hpb, tile, 1), jnp.float32),   # running max (per head)
                pltpu.VMEM((tile, width), jnp.float32),    # running denominator (lane-dense)
                pltpu.VMEM((tile, width), jnp.float32),    # running weighted sum (lane-dense)
            ]),
        compiler_params=pltpu.CompilerParams(
            dimension_semantics=("parallel", "parallel", "arbitrary")),
        cost_estimate=pl.CostEstimate(
            flops=2 * B * num_heads * Sp * Sp * dh,         # ~triangular QK^T + PV
            transcendentals=B * num_heads * Sp * Sp // 2,
            bytes_accessed=4 * B * Sp * hidden * itemsize),
    )(qi_tab, ki_tab, q, k, v)

    if Sp != S:
        ctx = ctx[:, :S, :]
    return ctx


# ----------------------------- parameter prep + module forward -----------------------------
def prepare_params(params, num_heads):
    """One-time prep: split per-head [q|k|v] columns into separate Q/K/V weights,
    fold 1/sqrt(head_dim) into Q, cast weights to bf16 (biases stay f32)."""
    w_qkv = params["w_qkv"]
    b_qkv = params["b_qkv"]
    hidden = w_qkv.shape[0]
    dh = hidden // num_heads
    scale = 1.0 / math.sqrt(dh)

    # The torch module views qkv as (..., num_heads, 3*dh) and chunks the last
    # axis, i.e. per-head contiguous [q | k | v] columns in w_qkv / b_qkv.
    w = w_qkv.reshape(hidden, num_heads, 3, dh)
    b = b_qkv.reshape(num_heads, 3, dh)
    wq = (w[:, :, 0, :] * scale).reshape(hidden, hidden)
    wk = w[:, :, 1, :].reshape(hidden, hidden)
    wv = w[:, :, 2, :].reshape(hidden, hidden)
    bq = (b[:, 0, :] * scale).reshape(hidden)
    bk = b[:, 1, :].reshape(hidden)
    bv = b[:, 2, :].reshape(hidden)

    bf16 = jnp.bfloat16
    return {
        "wq": wq.astype(bf16), "wk": wk.astype(bf16), "wv": wv.astype(bf16),
        "bq": bq.astype(jnp.float32), "bk": bk.astype(jnp.float32),
        "bv": bv.astype(jnp.float32),
        "w_dense": params["w_dense"].astype(bf16),
        "b_dense": params["b_dense"].astype(jnp.float32),
    }


def gpt2_self_attention(x, prep, num_heads, *, attn_tile=256):
    """x: (B, S, hidden) f32. Returns (B, S, hidden) f32."""
    B, S, hidden = x.shape
    dh = hidden // num_heads

    xb = x.astype(jnp.bfloat16).reshape(B * S, hidden)

    # Fused QKV projection: x read once, three bf16 outputs.
    q2d, k2d, v2d = pallas_qkv_projection(
        xb, prep["wq"], prep["wk"], prep["wv"], prep["bq"], prep["bk"], prep["bv"])
    q = q2d.reshape(B, S, hidden)
    k = k2d.reshape(B, S, hidden)
    v = v2d.reshape(B, S, hidden)

    # Causal flash attention over the triangular tile grid.
    ctx = pallas_flash_attention(q, k, v, num_heads, dh, tile_pref=attn_tile)

    # Output dense projection (f32 result).
    out = pallas_linear(ctx.reshape(B * S, hidden), prep["w_dense"], prep["b_dense"],
                        out_dtype=jnp.float32)
    # TODO(synk): resid dropout is identity (eval mode).
    return out.reshape(B, S, hidden)


# ----------------------------- pure-JAX fp32 reference for validation -----------------------------
def gpt2_self_attention_ref(x, params, num_heads, max_positions):
    B, S, hidden = x.shape
    head_dim = hidden // num_heads
    qkv = x @ params["w_qkv"] + params["b_qkv"]
    qkv = qkv.reshape(B, S, num_heads, 3 * head_dim)
    qkv = jnp.transpose(qkv, (0, 2, 1, 3))
    q, k, v = jnp.split(qkv, 3, axis=-1)
    s = jnp.einsum("bhqd,bhkd->bhqk", q, k) / math.sqrt(head_dim)
    mask = jnp.tril(jnp.ones((max_positions, max_positions), dtype=bool))[None, None]
    s = jnp.where(mask, s, jnp.float32(-10000.0))
    p = jax.nn.softmax(s, axis=-1)
    ctx = jnp.einsum("bhqk,bhkd->bhqd", p, v)
    ctx = jnp.transpose(ctx, (0, 2, 1, 3)).reshape(B, S, hidden)
    return ctx @ params["w_dense"] + params["b_dense"]


if __name__ == "__main__":
    def run_case(case_idx, B, S, hidden, num_heads, attn_tile):
        key = jax.random.fold_in(jax.random.PRNGKey(0), case_idx)
        kx, kw1, kb1, kw2, kb2 = jax.random.split(key, 5)
        x = jax.random.normal(kx, (B, S, hidden), jnp.float32)
        params = {
            "w_qkv": jax.random.normal(kw1, (hidden, 3 * hidden), jnp.float32) * 0.02,
            "b_qkv": jax.random.normal(kb1, (3 * hidden,), jnp.float32) * 0.02,
            "w_dense": jax.random.normal(kw2, (hidden, hidden), jnp.float32) * 0.02,
            "b_dense": jax.random.normal(kb2, (hidden,), jnp.float32) * 0.02,
        }
        prep = prepare_params(params, num_heads)
        out = gpt2_self_attention(x, prep, num_heads, attn_tile=attn_tile)
        out = jax.block_until_ready(out)
        ref = gpt2_self_attention_ref(x, params, num_heads, max_positions=S)
        assert out.shape == (B, S, hidden)
        err = float(jnp.max(jnp.abs(out - ref)))
        # Tolerance reflects bf16 activations/weights (fp32 accumulation) and the
        # hardware approximate reciprocal in the softmax normalization.
        assert jnp.allclose(out, ref, atol=1e-2, rtol=5e-2), \
            f"case {case_idx}: mismatch vs reference (max abs err {err})"

    # Primary small config: hidden=32, heads=4 (head_dim=8), seq = max_positions = 8, batch=2.
    run_case(0, B=2, S=8, hidden=32, num_heads=4, attn_tile=256)
    # Multi-tile config: 4 q-tiles / 10 triangular (qi, ki) pairs exercises the
    # online-softmax carry, the off-diagonal (unmasked) path and init/finalize.
    run_case(1, B=2, S=32, hidden=32, num_heads=4, attn_tile=8)

    print("KERNEL_OK")
</pallas_src>

<mosaic_0001>
module attributes {stable_mosaic.version = 11 : i64} {
  func.func @_qkv_linear_kernel(%arg0: i32, %arg1: i32, %arg2: i32, %arg3: memref<16x32xbf16, #tpu.memory_space<vmem>>, %arg4: memref<32x32xbf16, #tpu.memory_space<vmem>>, %arg5: memref<32x32xbf16, #tpu.memory_space<vmem>>, %arg6: memref<32x32xbf16, #tpu.memory_space<vmem>>, %arg7: memref<1x32xf32, #tpu.memory_space<vmem>>, %arg8: memref<1x32xf32, #tpu.memory_space<vmem>>, %arg9: memref<1x32xf32, #tpu.memory_space<vmem>>, %arg10: memref<16x32xbf16, #tpu.memory_space<vmem>>, %arg11: memref<16x32xbf16, #tpu.memory_space<vmem>>, %arg12: memref<16x32xbf16, #tpu.memory_space<vmem>>, %arg13: memref<16x32xf32, #tpu.memory_space<vmem>>, %arg14: memref<16x32xf32, #tpu.memory_space<vmem>>, %arg15: memref<16x32xf32, #tpu.memory_space<vmem>>) attributes {dimension_semantics = [#tpu.dimension_semantics<parallel>, #tpu.dimension_semantics<parallel>, #tpu.dimension_semantics<arbitrary>], iteration_bounds = array<i64: 1, 1, 1>, scalar_prefetch = 0 : i64, scratch_operands = 3 : i64, tpu.core_type = #tpu.core_type<tc>, window_params = [{transform_indices = @transform_0, window_bounds = array<i64: 16, 32>}, {transform_indices = @transform_1, window_bounds = array<i64: 32, 32>}, {transform_indices = @transform_2, window_bounds = array<i64: 32, 32>}, {transform_indices = @transform_3, window_bounds = array<i64: 32, 32>}, {transform_indices = @transform_4, window_bounds = array<i64: 1, 32>}, {transform_indices = @transform_5, window_bounds = array<i64: 1, 32>}, {transform_indices = @transform_6, window_bounds = array<i64: 1, 32>}, {transform_indices = @transform_7, window_bounds = array<i64: 16, 32>}, {transform_indices = @transform_8, window_bounds = array<i64: 16, 32>}, {transform_indices = @transform_9, window_bounds = array<i64: 16, 32>}]} {
    %c0_i32 = arith.constant 0 : i32
    %0 = arith.cmpi eq, %arg2, %c0_i32 : i32
    %1 = arith.extui %0 : i1 to i32
    %c0_i32_0 = arith.constant 0 : i32
    %2 = arith.cmpi ne, %1, %c0_i32_0 : i32
    scf.if %2 {
      %cst_24 = arith.constant 0.000000e+00 : f32
      %22 = vector.broadcast %cst_24 : f32 to vector<16x32xf32>
      %c0_25 = arith.constant 0 : index
      %c0_26 = arith.constant 0 : index
      %23 = vector.load %arg13[%c0_25, %c0_26] : memref<16x32xf32, #tpu.memory_space<vmem>>, vector<16x32xf32>
      tpu.vector_store %arg13[%c0_25, %c0_26], %22 {strides = array<i32>} : memref<16x32xf32, #tpu.memory_space<vmem>>, vector<16x32xf32>,
      %cst_27 = arith.constant 0.000000e+00 : f32
      %24 = vector.broadcast %cst_27 : f32 to vector<16x32xf32>
      %c0_28 = arith.constant 0 : index
      %c0_29 = arith.constant 0 : index
      %25 = vector.load %arg14[%c0_28, %c0_29] : memref<16x32xf32, #tpu.memory_space<vmem>>, vector<16x32xf32>
      tpu.vector_store %arg14[%c0_28, %c0_29], %24 {strides = array<i32>} : memref<16x32xf32, #tpu.memory_space<vmem>>, vector<16x32xf32>,
      %cst_30 = arith.constant 0.000000e+00 : f32
      %26 = vector.broadcast %cst_30 : f32 to vector<16x32xf32>
      %c0_31 = arith.constant 0 : index
      %c0_32 = arith.constant 0 : index
      %27 = vector.load %arg15[%c0_31, %c0_32] : memref<16x32xf32, #tpu.memory_space<vmem>>, vector<16x32xf32>
      tpu.vector_store %arg15[%c0_31, %c0_32], %26 {strides = array<i32>} : memref<16x32xf32, #tpu.memory_space<vmem>>, vector<16x32xf32>,
    } else {
    }
    %c0 = arith.constant 0 : index
    %c0_1 = arith.constant 0 : index
    %3 = vector.load %arg3[%c0, %c0_1] : memref<16x32xbf16, #tpu.memory_space<vmem>>, vector<16x32xbf16>
    %c0_2 = arith.constant 0 : index
    %c0_3 = arith.constant 0 : index
    %4 = vector.load %arg13[%c0_2, %c0_3] : memref<16x32xf32, #tpu.memory_space<vmem>>, vector<16x32xf32>
    %c0_4 = arith.constant 0 : index
    %c0_5 = arith.constant 0 : index
    %5 = vector.load %arg4[%c0_4, %c0_5] : memref<32x32xbf16, #tpu.memory_space<vmem>>, vector<32x32xbf16>
    %cst = arith.constant dense<0.000000e+00> : vector<16x32xf32>
    %6 = tpu.matmul %3, %5, %cst {dimension_numbers = #tpu.dot_dimension_numbers<[1], [0], [0], [1], [0, 0, 1, 1], [], []>} : vector<16x32xbf16>, vector<32x32xbf16>, vector<16x32xf32> -> vector<16x32xf32>
    %7 = arith.addf %4, %6 : vector<16x32xf32>
    %c0_6 = arith.constant 0 : index
    %c0_7 = arith.constant 0 : index
    %8 = vector.load %arg13[%c0_6, %c0_7] : memref<16x32xf32, #tpu.memory_space<vmem>>, vector<16x32xf32>
    tpu.vector_store %arg13[%c0_6, %c0_7], %7 {strides = array<i32>} : memref<16x32xf32, #tpu.memory_space<vmem>>, vector<16x32xf32>,
    %c0_8 = arith.constant 0 : index
    %c0_9 = arith.constant 0 : index
    %9 = vector.load %arg14[%c0_8, %c0_9] : memref<16x32xf32, #tpu.memory_space<vmem>>, vector<16x32xf32>
    %c0_10 = arith.constant 0 : index
    %c0_11 = arith.constant 0 : index
    %10 = vector.load %arg5[%c0_10, %c0_11] : memref<32x32xbf16, #tpu.memory_space<vmem>>, vector<32x32xbf16>
    %cst_12 = arith.constant dense<0.000000e+00> : vector<16x32xf32>
    %11 = tpu.matmul %3, %10, %cst_12 {dimension_numbers = #tpu.dot_dimension_numbers<[1], [0], [0], [1], [0, 0, 1, 1], [], []>} : vector<16x32xbf16>, vector<32x32xbf16>, vector<16x32xf32> -> vector<16x32xf32>
    %12 = arith.addf %9, %11 : vector<16x32xf32>
    %c0_13 = arith.constant 0 : index
    %c0_14 = arith.constant 0 : index
    %13 = vector.load %arg14[%c0_13, %c0_14] : memref<16x32xf32, #tpu.memory_space<vmem>>, vector<16x32xf32>
    tpu.vector_store %arg14[%c0_13, %c0_14], %12 {strides = array<i32>} : memref<16x32xf32, #tpu.memory_space<vmem>>, vector<16x32xf32>,
    %c0_15 = arith.constant 0 : index
    %c0_16 = arith.constant 0 : index
    %14 = vector.load %arg15[%c0_15, %c0_16] : memref<16x32xf32, #tpu.memory_space<vmem>>, vector<16x32xf32>
    %c0_17 = arith.constant 0 : index
    %c0_18 = arith.constant 0 : index
    %15 = vector.load %arg6[%c0_17, %c0_18] : memref<32x32xbf16, #tpu.memory_space<vmem>>, vector<32x32xbf16>
    %cst_19 = arith.constant dense<0.000000e+00> : vector<16x32xf32>
    %16 = tpu.matmul %3, %15, %cst_19 {dimension_numbers = #tpu.dot_dimension_numbers<[1], [0], [0], [1], [0, 0, 1, 1], [], []>} : vector<16x32xbf16>, vector<32x32xbf16>, vector<16x32xf32> -> vector<16x32xf32>
    %17 = arith.addf %14, %16 : vector<16x32xf32>
    %c0_20 = arith.constant 0 : index
    %c0_21 = arith.constant 0 : index
    %18 = vector.load %arg15[%c0_20, %c0_21] : memref<16x32xf32, #tpu.memory_space<vmem>>, vector<16x32xf32>
    tpu.vector_store %arg15[%c0_20, %c0_21], %17 {strides = array<i32>} : memref<16x32xf32, #tpu.memory_space<vmem>>, vector<16x32xf32>,
    %c0_i32_22 = arith.constant 0 : i32
    %19 = arith.cmpi eq, %arg2, %c0_i32_22 : i32
    %20 = arith.extui %19 : i1 to i32
    %c0_i32_23 = arith.constant 0 : i32
    %21 = arith.cmpi ne, %20, %c0_i32_23 : i32
    scf.if %21 {
      %c0_24 = arith.constant 0 : index
      %c0_25 = arith.constant 0 : index
      %22 = vector.load %arg13[%c0_24, %c0_25] : memref<16x32xf32, #tpu.memory_space<vmem>>, vector<16x32xf32>
      %c0_26 = arith.constant 0 : index
      %c0_27 = arith.constant 0 : index
      %23 = vector.load %arg7[%c0_26, %c0_27] : memref<1x32xf32, #tpu.memory_space<vmem>>, vector<1x32xf32>
      %24 = vector.broadcast %23 : vector<1x32xf32> to vector<16x32xf32>
      %25 = arith.addf %22, %24 : vector<16x32xf32>
      %26 = arith.truncf %25 : vector<16x32xf32> to vector<16x32xbf16>
      %c0_28 = arith.constant 0 : index
      %c0_29 = arith.constant 0 : index
      %27 = vector.load %arg10[%c0_28, %c0_29] : memref<16x32xbf16, #tpu.memory_space<vmem>>, vector<16x32xbf16>
      tpu.vector_store %arg10[%c0_28, %c0_29], %26 {strides = array<i32>} : memref<16x32xbf16, #tpu.memory_space<vmem>>, vector<16x32xbf16>,
      %c0_30 = arith.constant 0 : index
      %c0_31 = arith.constant 0 : index
      %28 = vector.load %arg14[%c0_30, %c0_31] : memref<16x32xf32, #tpu.memory_space<vmem>>, vector<16x32xf32>
      %c0_32 = arith.constant 0 : index
      %c0_33 = arith.constant 0 : index
      %29 = vector.load %arg8[%c0_32, %c0_33] : memref<1x32xf32, #tpu.memory_space<vmem>>, vector<1x32xf32>
      %30 = vector.broadcast %29 : vector<1x32xf32> to vector<16x32xf32>
      %31 = arith.addf %28, %30 : vector<16x32xf32>
      %32 = arith.truncf %31 : vector<16x32xf32> to vector<16x32xbf16>
      %c0_34 = arith.constant 0 : index
      %c0_35 = arith.constant 0 : index
      %33 = vector.load %arg11[%c0_34, %c0_35] : memref<16x32xbf16, #tpu.memory_space<vmem>>, vector<16x32xbf16>
      tpu.vector_store %arg11[%c0_34, %c0_35], %32 {strides = array<i32>} : memref<16x32xbf16, #tpu.memory_space<vmem>>, vector<16x32xbf16>,
      %c0_36 = arith.constant 0 : index
      %c0_37 = arith.constant 0 : index
      %34 = vector.load %arg15[%c0_36, %c0_37] : memref<16x32xf32, #tpu.memory_space<vmem>>, vector<16x32xf32>
      %c0_38 = arith.constant 0 : index
      %c0_39 = arith.constant 0 : index
      %35 = vector.load %arg9[%c0_38, %c0_39] : memref<1x32xf32, #tpu.memory_space<vmem>>, vector<1x32xf32>
      %36 = vector.broadcast %35 : vector<1x32xf32> to vector<16x32xf32>
      %37 = arith.addf %34, %36 : vector<16x32xf32>
      %38 = arith.truncf %37 : vector<16x32xf32> to vector<16x32xbf16>
      %c0_40 = arith.constant 0 : index
      %c0_41 = arith.constant 0 : index
      %39 = vector.load %arg12[%c0_40, %c0_41] : memref<16x32xbf16, #tpu.memory_space<vmem>>, vector<16x32xbf16>
      tpu.vector_store %arg12[%c0_40, %c0_41], %38 {strides = array<i32>} : memref<16x32xbf16, #tpu.memory_space<vmem>>, vector<16x32xbf16>,
    } else {
    }
    return
  }
  func.func @transform_0(%arg0: i32, %arg1: i32, %arg2: i32) -> (i32, i32) {
    %c0_i32 = arith.constant 0 : i32
    return %arg0, %arg2 : i32, i32
  }
  func.func @transform_1(%arg0: i32, %arg1: i32, %arg2: i32) -> (i32, i32) {
    %c0_i32 = arith.constant 0 : i32
    return %arg2, %arg1 : i32, i32
  }
  func.func @transform_2(%arg0: i32, %arg1: i32, %arg2: i32) -> (i32, i32) {
    %c0_i32 = arith.constant 0 : i32
    return %arg2, %arg1 : i32, i32
  }
  func.func @transform_3(%arg0: i32, %arg1: i32, %arg2: i32) -> (i32, i32) {
    %c0_i32 = arith.constant 0 : i32
    return %arg2, %arg1 : i32, i32
  }
  func.func @transform_4(%arg0: i32, %arg1: i32, %arg2: i32) -> (i32, i32) {
    %c0_i32 = arith.constant 0 : i32
    %c0_i32_0 = arith.constant 0 : i32
    return %c0_i32, %arg1 : i32, i32
  }
  func.func @transform_5(%arg0: i32, %arg1: i32, %arg2: i32) -> (i32, i32) {
    %c0_i32 = arith.constant 0 : i32
    %c0_i32_0 = arith.constant 0 : i32
    return %c0_i32, %arg1 : i32, i32
  }
  func.func @transform_6(%arg0: i32, %arg1: i32, %arg2: i32) -> (i32, i32) {
    %c0_i32 = arith.constant 0 : i32
    %c0_i32_0 = arith.constant 0 : i32
    return %c0_i32, %arg1 : i32, i32
  }
  func.func @transform_7(%arg0: i32, %arg1: i32, %arg2: i32) -> (i32, i32) {
    %c0_i32 = arith.constant 0 : i32
    return %arg0, %arg1 : i32, i32
  }
  func.func @transform_8(%arg0: i32, %arg1: i32, %arg2: i32) -> (i32, i32) {
    %c0_i32 = arith.constant 0 : i32
    return %arg0, %arg1 : i32, i32
  }
  func.func @transform_9(%arg0: i32, %arg1: i32, %arg2: i32) -> (i32, i32) {
    %c0_i32 = arith.constant 0 : i32
    return %arg0, %arg1 : i32, i32
  }
}

</mosaic_0001>

<bundles_post_ra>
// kernel: tpu_custom_call.1
= control target key start
LH: loop header
LB: loop body
LE: loop exit
PB: predicated region body
PF: predicated region fallthrough
CT: control target
= control target key end

     0   :  { %15 = vsyncpa [#allocation6], 0  ;;  %s682_s0 = inlined_call_operand.hbm [shape: bf16[16,32], index: 0, kind: input, shape index: {}]   ;;  %s683_s1 = inlined_call_operand.hbm [shape: bf16[32,32], index: 1, kind: input, shape index: {}]   ;;  %s684_s2 = inlined_call_operand.hbm [shape: bf16[32,32], index: 2, kind: input, shape index: {}]   ;;  %s685_s3 = inlined_call_operand.hbm [shape: bf16[32,32], index: 3, kind: input, shape index: {}]   ;;  %s686_s4 = inlined_call_operand.vmem [shape: f32[1,32], index: 4, kind: input, shape index: {}]   ;;  %s687_s5 = inlined_call_operand.vmem [shape: f32[1,32], index: 5, kind: input, shape index: {}]   ;;  %s688_s6 = inlined_call_operand.vmem [shape: f32[1,32], index: 6, kind: input, shape index: {}]   ;;  %s689_s7 = inlined_call_operand.hbm [shape: bf16[16,32], index: 7, kind: output, shape index: {0}]   ;;  %s690_s8 = inlined_call_operand.hbm [shape: bf16[16,32], index: 8, kind: output, shape index: {1}]   ;;  %s691_s9 = inlined_call_operand.hbm [shape: bf16[16,32], index: 9, kind: output, shape index: {2}]  }
   0x1   :  { %16 = vsyncpa [#allocation9], 0 }
   0x2   :  { %17 = vsyncpa [#allocation12], 0 }
   0x3   :  { %18 = vsyncpa [#allocation7], 0 }
   0x4   :  { %19 = vsyncpa [#allocation15], 0  ;;  %s37_s11 = sshll.u32 %s683_s1, 4  ;;  %s550_s12 = smov [#allocation8]   ;;  %s38_s11 = int_to_ptr.hbm [resolvable:$true] %s37_s11 }
   0x5   :  { %s39_s13 = sshll.u32 %s550_s12, 4  ;;  %s24_s16 = sshll.u32 %s682_s0, 4  ;;  %s40_s13 = int_to_ptr.vmem [resolvable:$true] %s39_s13  ;;  %s25_s16 = int_to_ptr.hbm [resolvable:$true] %s24_s16 }
   0x6   :  { %s551_s17 = smov 64   ;;  %s552_s18 = smov 4  }
   0x7   :  { %45 = dma.hbm_to_vmem [thread:$0]  %s38_s11, 256, %s40_s13, [#allocation9], %s551_s17, %s551_s17, %s552_s18  }
   0x8   :  { %s553_s19 = smov [#allocation5]   ;;  %s50_s1 = sshll.u32 %s684_s2, 4  ;;  %s51_s1 = int_to_ptr.hbm [resolvable:$true] %s50_s1 }
   0x9   :  { %s26_s20 = sshll.u32 %s553_s19, 4  ;;  %s63_s24 = sshll.u32 %s685_s3, 4  ;;  %s27_s20 = int_to_ptr.vmem [resolvable:$true] %s26_s20  ;;  %s64_s24 = int_to_ptr.hbm [resolvable:$true] %s63_s24 }
   0xa   :  { %32 = dma.hbm_to_vmem [thread:$0]  %s25_s16, 128, %s27_s20, [#allocation6], %s551_s17, %s551_s17, %s552_s18  }
   0xb   :  { %s554_s25 = smov [#allocation10]   ;;  %s555_s27 = smov [#allocation11]  }
   0xc   :  { %s52_s26 = sshll.u32 %s554_s25, 4  ;;  %s65_s2 = sshll.u32 %s555_s27, 4  ;;  %s53_s26 = int_to_ptr.vmem [resolvable:$true] %s52_s26  ;;  %s66_s2 = int_to_ptr.vmem [resolvable:$true] %s65_s2 }
   0xd   :  { %58 = dma.hbm_to_vmem [thread:$0]  %s51_s1, 256, %s53_s26, [#allocation9], %s551_s17, %s551_s17, %s552_s18  }
   0xe   :  { %71 = dma.hbm_to_vmem [thread:$0]  %s64_s24, 256, %s66_s2, [#allocation12], %s551_s17, %s551_s17, %s552_s18  }
   0xf   :  { %540 = dma.done.wait [#allocation6], 128  }
  0x10   :  { %541 = vsyncadd [#allocation6], 4294967168 }
  0x11   :  { %542 = dma.done.wait [#allocation9], 512  }
  0x12   :  { %543 = vsyncadd [#allocation9], 4294966784 }
  0x13   :  { %544 = dma.done.wait [#allocation12], 256  }
  0x14   :  { %545 = vsyncadd [#allocation12], 4294967040  ;;  %vm99_vm0 = vcmask 261120   ;;  %v556_v0 = vmov 0.0   ;;  %v354_v1 = vld [vmem:[#allocation8 + $0x8] sm:$0xff]  ;;  %v356_v2 = vld [vmem:[#allocation10 + $0x8] sm:$0xff] }
  0x15   :  { %100 = vst.msk [vmem:[#allocation2] sm:$0xff] %vm99_vm0, %v556_v0  ;;  %v358_v3 = vld [vmem:[#allocation11 + $0x8] sm:$0xff]  ;;  %141 = vmatpush.bf16.msra.mxu0 %v354_v1  ;;  %177 = vmatpush.bf16.msra.mxu1 %v356_v2  ;;  %v353_v4 = vld [vmem:[#allocation8] sm:$0xff]  ;;  %v355_v5 = vld [vmem:[#allocation10] sm:$0xff]  ;;  %vm238_vm1 = vcmask 257024   ;;  %s271_s14 = sshll.u32 %s689_s7, 4  ;;  %s272_s14 = int_to_ptr.hbm [resolvable:$true] %s271_s14 }
  0x16   :  { %101 = vst.msk [vmem:[#allocation2 + $0x8] sm:$0xff] %vm99_vm0, %v556_v0  ;;  %213 = vmatpush.bf16.msra.mxu2 %v358_v3  ;;  %v357_v6 = vld [vmem:[#allocation11] sm:$0xff]  ;;  %v352_v7 = vld [vmem:[#allocation5] sm:$0xff]  ;;  %v370_v18 = vld [vmem:[%s686_s4] ss:$0 sm:$0xff]  ;;  %s558_s15 = smov [#allocation14]  }
  0x17   :  { %102 = vst.msk [vmem:[#allocation3] sm:$0xff] %vm99_vm0, %v556_v0  ;;  %v369_v22 = vld [vmem:[%s687_s5] ss:$0 sm:$0xff]  ;;  %s557_s5 = smov [#allocation13]   ;;  %s284_s20 = sshll.u32 %s690_s8, 4  ;;  %s285_s20 = int_to_ptr.hbm [resolvable:$true] %s284_s20 }
  0x18   :  { %103 = vst.msk [vmem:[#allocation3 + $0x8] sm:$0xff] %vm99_vm0, %v556_v0  ;;  %v371_v32 = vld [vmem:[%s688_s6] ss:$0 sm:$0xff]  ;;  %s269_s11 = sshll.u32 %s557_s5, 4  ;;  %s282_s6 = sshll.u32 %s558_s15, 4  ;;  %s270_s11 = int_to_ptr.vmem [resolvable:$true] %s269_s11  ;;  %s283_s6 = int_to_ptr.vmem [resolvable:$true] %s282_s6 }
  0x19   :  { %104 = vst.msk [vmem:[#allocation4] sm:$0xff] %vm99_vm0, %v556_v0  ;;  %142 = vmatpush.bf16.msra.mxu0 %v353_v4  ;;  %178 = vmatpush.bf16.msra.mxu1 %v355_v5  ;;  %s559_s7 = smov [#allocation16]   ;;  %s297_s0 = sshll.u32 %s691_s9, 4  ;;  %s298_s0 = int_to_ptr.hbm [resolvable:$true] %s297_s0 }
  0x1a   :  { %105 = vst.msk [vmem:[#allocation4 + $0x8] sm:$0xff] %vm99_vm0, %v556_v0  ;;  %214 = vmatpush.bf16.msra.mxu2 %v357_v6  ;;  %s295_s21 = sshll.u32 %s559_s7, 4  ;;  %s296_s21 = int_to_ptr.vmem [resolvable:$true] %s295_s21 }
  0x1c   :  { %333 = vmatmul.msk.bf16.vlgmr.msra.gmra.mxu0 %vm99_vm0, %v352_v7  ;;  %342 = vmatmul.msk.bf16.vlgmr.msra.gmra.mxu1 %vm99_vm0, %v352_v7  ;;  %v108_v8 = vld [vmem:[#allocation2] sm:$0xff] }
  0x1d   :  { %351 = vmatmul.msk.bf16.vlgmr.msra.gmra.mxu2 %vm99_vm0, %v352_v7  ;;  %v109_v15 = vld [vmem:[#allocation2 + $0x8] sm:$0xff] }
  0x1e   :  { %v153_v9 = vld [vmem:[#allocation3] sm:$0xff] }
  0x1f   :  { %v154_v16 = vld [vmem:[#allocation3 + $0x8] sm:$0xff] }
  0x20   :  { %v189_v14 = vld [vmem:[#allocation4] sm:$0xff] }
  0x21   :  { %v190_v29 = vld [vmem:[#allocation4 + $0x8] sm:$0xff] }
  0x99   :  { %v144_v10 = vpop.f32.mrf.mxu0  ;;  %v180_v11 = vpop.f32.mrf.mxu1 }
  0x9a   :  { %v149_v12 = vadd.f32 %v144_v10, %v108_v8  ;;  %v185_v13 = vadd.f32 %v180_v11, %v153_v9 }
  0x9c   :  { %151 = vst.msk [vmem:[#allocation2] sm:$0xff] %vm99_vm0, %v149_v12 }
  0x9d   :  { %187 = vst.msk [vmem:[#allocation3] sm:$0xff] %vm99_vm0, %v185_v13 }
  0xa0   :  { %v216_v17 = vpop.f32.mrf.mxu2 }
  0xa1   :  { %v221_v19 = vadd.f32 %v216_v17, %v189_v14  ;;  %v146_v20 = vpop.f32.mrf.mxu0  ;;  %v182_v21 = vpop.f32.mrf.mxu1 }
  0xa2   :  { %v150_v23 = vadd.f32 %v146_v20, %v109_v15  ;;  %v186_v24 = vadd.f32 %v182_v21, %v154_v16 }
  0xa3   :  { %223 = vst.msk [vmem:[#allocation4] sm:$0xff] %vm99_vm0, %v221_v19  ;;  %v228_v25 = vld [vmem:[#allocation2] sm:$0xff] }
  0xa4   :  { %152 = vst.msk [vmem:[#allocation2 + $0x8] sm:$0xff] %vm99_vm0, %v150_v23  ;;  %v241_v26 = vld [vmem:[#allocation3] sm:$0xff]  ;;  %v234_v27 = vadd.f32 %v370_v18, %v228_v25 }
  0xa5   :  { %188 = vst.msk [vmem:[#allocation3 + $0x8] sm:$0xff] %vm99_vm0, %v186_v24  ;;  %v247_v28 = vadd.f32 %v369_v22, %v241_v26 }
  0xa6   :  { %v236_v30 = vpack.c.bf16 %v234_v27, %v234_v27 }
  0xa7   :  { %v249_v31 = vpack.c.bf16 %v247_v28, %v247_v28 }
  0xa8   :  { %v218_v33 = vpop.f32.mrf.mxu2  ;;  %239 = vst.msk [vmem:[#allocation13] sm:$0xf] %vm238_vm1, %v236_v30 }
  0xa9   :  { %v222_v34 = vadd.f32 %v218_v33, %v190_v29  ;;  %251 = vst.msk [vmem:[#allocation14] sm:$0xf] %vm238_vm1, %v249_v31 }
  0xaa   :  { %v253_v35 = vld [vmem:[#allocation4] sm:$0xff] }
  0xab   :  { %224 = vst.msk [vmem:[#allocation4 + $0x8] sm:$0xff] %vm99_vm0, %v222_v34  ;;  %v229_v36 = vld [vmem:[#allocation2 + $0x8] sm:$0xff]  ;;  %v259_v37 = vadd.f32 %v371_v32, %v253_v35 }
  0xac   :  { %v242_v38 = vld [vmem:[#allocation3 + $0x8] sm:$0xff]  ;;  %v235_v39 = vadd.f32 %v370_v18, %v229_v36 }
  0xad   :  { %v248_v40 = vadd.f32 %v369_v22, %v242_v38  ;;  %v261_v41 = vpack.c.bf16 %v259_v37, %v259_v37 }
  0xae   :  { %v237_v42 = vpack.c.bf16 %v235_v39, %v235_v39 }
  0xaf   :  { %v250_v43 = vpack.c.bf16 %v248_v40, %v248_v40  ;;  %263 = vst.msk [vmem:[#allocation16] sm:$0xf] %vm238_vm1, %v261_v41 }
  0xb0   :  { %240 = vst.msk [vmem:[#allocation13 + $0x4] sm:$0xf] %vm238_vm1, %v237_v42 }
  0xb1   :  { %252 = vst.msk [vmem:[#allocation14 + $0x4] sm:$0xf] %vm238_vm1, %v250_v43  ;;  %277 = dma.vmem_to_hbm [thread:$0]  %s270_s11, 128, %s272_s14, [#allocation7], %s551_s17, %s551_s17, %s552_s18  }
  0xb2   :  { %290 = dma.vmem_to_hbm [thread:$0]  %s283_s6, 128, %s285_s20, [#allocation15], %s551_s17, %s551_s17, %s552_s18   ;;  %v254_v44 = vld [vmem:[#allocation4 + $0x8] sm:$0xff] }
  0xb3   :  { %v260_v45 = vadd.f32 %v371_v32, %v254_v44 }
  0xb5   :  { %v262_v46 = vpack.c.bf16 %v260_v45, %v260_v45 }
  0xb7   :  { %264 = vst.msk [vmem:[#allocation16 + $0x4] sm:$0xf] %vm238_vm1, %v262_v46 }
  0xb8   :  { %303 = dma.vmem_to_hbm [thread:$0]  %s296_s21, 128, %s298_s0, [#allocation15], %s551_s17, %s551_s17, %s552_s18  }
  0xb9   :  { %546 = dma.done.wait [#allocation7], 128  }
  0xba   :  { %547 = vsyncadd [#allocation7], 4294967168 }
  0xbb   :  { %548 = dma.done.wait [#allocation15], 256  }
  0xbc   :  { %549 = vsyncadd [#allocation15], 4294967040 }
  0xbd   :  { %316 = vsyncpa [#allocation6], 1 }
  0xbe   :  { %317 = vsyncpa [#allocation9], 1 }
  0xbf   :  { %318 = vsyncpa [#allocation12], 1 }
  0xc0   :  { %319 = vsyncpa [#allocation7], 1 }
  0xc1   :  { %320 = vsyncpa [#allocation15], 1 }

</bundles_post_ra>
